<compile_context>
chip_gen: v6e
topology: v6e:2x2x1
jax: 0.10.0
libtpu: 0.0.40
codegen_flags: <defaults>
</compile_context>

<pallas_src>
import jax
import jax.numpy as jnp
from jax.experimental import pallas as pl
from jax.experimental.pallas import tpu as pltpu

_LANES = 1024          # lane-dense last dim (multiple of 128)
_TILE_R = 512          # rows per tile -> 512*1024*4B = 2 MiB f32 per tile


def _act_kernel(x_ref, o_ref):
    x = x_ref[...]
    # 2*sigmoid(x) == tanh(x/2) + 1  (one EUP tanh + one VPU mul + one VPU add)
    o_ref[...] = (jnp.tanh(x * 0.5) + 1.0).astype(o_ref.dtype)


def act_op(x: jnp.ndarray) -> jnp.ndarray:
    """Elementwise 2*sigmoid(x) as a lane-dense, tiled Pallas TPU kernel."""
    orig_shape = x.shape
    orig_dtype = x.dtype

    # TODO(synk): for tiny activations XLA fusion of 2*sigmoid into the
    # producer is preferable; the Pallas path is intended for large tensors.
    if x.ndim == 0 or x.size == 0:
        return (2.0 * jax.nn.sigmoid(x)).astype(orig_dtype)

    n = int(x.size)

    # Flatten and pad to a lane-dense (rows, _LANES) slab.
    rows = pl.cdiv(n, _LANES)
    flat = x.reshape(-1)
    pad = rows * _LANES - n
    if pad:
        flat = jnp.pad(flat, (0, pad))
    x2d = flat.reshape(rows, _LANES)

    # Row tile: either the full extent (small inputs) or a multiple of 8.
    tile_r = rows if rows <= _TILE_R else _TILE_R
    grid = (pl.cdiv(rows, tile_r),)

    out2d = pl.pallas_call(
        _act_kernel,
        out_shape=jax.ShapeDtypeStruct((rows, _LANES), orig_dtype),
        grid=grid,
        in_specs=[pl.BlockSpec((tile_r, _LANES), lambda i: (i, 0))],
        out_specs=pl.BlockSpec((tile_r, _LANES), lambda i: (i, 0)),
        compiler_params=pltpu.CompilerParams(
            dimension_semantics=("parallel",),
            vmem_limit_bytes=32 * 1024 * 1024,
        ),
    )(x2d)

    # Drop padding and restore the original (N, C, L) layout.
    return out2d.reshape(-1)[:n].reshape(orig_shape)


if __name__ == "__main__":
    key = jax.random.PRNGKey(0)

    ok = True
    # Small 1D-model-style inputs: (batch, channels, length). The second shape
    # exercises the padded-tail path (size not a multiple of the lane width).
    for shape in [(2, 4, 16), (3, 5, 700)]:
        key, sub = jax.random.split(key)
        x = jax.random.normal(sub, shape, dtype=jnp.float32)

        y = act_op(x)
        jax.block_until_ready(y)

        y_ref = 2.0 * jax.nn.sigmoid(x)
        ok &= (y.shape == x.shape) and (y.dtype == x.dtype)
        ok &= bool(jnp.allclose(y, y_ref, atol=1e-5, rtol=1e-5))

    if ok:
        print("KERNEL_OK")
</pallas_src>

<mosaic_0001>
module attributes {stable_mosaic.version = 11 : i64} {
  func.func @_act_kernel(%arg0: i32, %arg1: memref<1x1024xf32, #tpu.memory_space<vmem>>, %arg2: memref<1x1024xf32, #tpu.memory_space<vmem>>) attributes {dimension_semantics = [#tpu.dimension_semantics<parallel>], iteration_bounds = array<i64: 1>, scalar_prefetch = 0 : i64, scratch_operands = 0 : i64, tpu.core_type = #tpu.core_type<tc>, window_params = [{transform_indices = @transform_0, window_bounds = array<i64: 1, 1024>}, {transform_indices = @transform_1, window_bounds = array<i64: 1, 1024>}]} {
    %c0 = arith.constant 0 : index
    %c0_0 = arith.constant 0 : index
    %0 = vector.load %arg1[%c0, %c0_0] : memref<1x1024xf32, #tpu.memory_space<vmem>>, vector<1x1024xf32>
    %cst = arith.constant 5.000000e-01 : f32
    %1 = vector.broadcast %cst : f32 to vector<1x1024xf32>
    %2 = arith.mulf %0, %1 : vector<1x1024xf32>
    %3 = math.tanh %2 : vector<1x1024xf32>
    %cst_1 = arith.constant 1.000000e+00 : f32
    %4 = vector.broadcast %cst_1 : f32 to vector<1x1024xf32>
    %5 = arith.addf %3, %4 : vector<1x1024xf32>
    %c0_2 = arith.constant 0 : index
    %c0_3 = arith.constant 0 : index
    %6 = vector.load %arg2[%c0_2, %c0_3] : memref<1x1024xf32, #tpu.memory_space<vmem>>, vector<1x1024xf32>
    tpu.vector_store %arg2[%c0_2, %c0_3], %5 {strides = array<i32>} : memref<1x1024xf32, #tpu.memory_space<vmem>>, vector<1x1024xf32>,
    return
  }
  func.func @transform_0(%arg0: i32) -> (i32, i32) {
    %c0_i32 = arith.constant 0 : i32
    %c0_i32_0 = arith.constant 0 : i32
    return %arg0, %c0_i32 : i32, i32
  }
  func.func @transform_1(%arg0: i32) -> (i32, i32) {
    %c0_i32 = arith.constant 0 : i32
    %c0_i32_0 = arith.constant 0 : i32
    return %arg0, %c0_i32 : i32, i32
  }
}

</mosaic_0001>

<bundles_post_ra>
// kernel: tpu_custom_call.1
= control target key start
LH: loop header
LB: loop body
LE: loop exit
PB: predicated region body
PF: predicated region fallthrough
CT: control target
= control target key end

     0   :  { %6 = vsyncpa [#allocation3], 0  ;;  %s107_s0 = inlined_call_operand.hbm [shape: f32[1,1024], index: 0, kind: input, shape index: {}]   ;;  %s108_s1 = inlined_call_operand.hbm [shape: f32[1,1024], index: 1, kind: output, shape index: {}]  }
   0x1   :  { %7 = vsyncpa [#allocation4], 0  ;;  %s89_s6 = smov [#allocation2]  }
   0x2   :  { %s14_s7 = sshll.u32 %s89_s6, 4  ;;  %s15_s7 = int_to_ptr.vmem [resolvable:$true] %s14_s7 }
   0x3   :  { %s53_s8 = scalar_lea.vmem %s15_s7, 128  ;;  %p58_p1 = scmp.lt.s32.totalorder %s15_s7, %s15_s7 }
   0x4   :  { %p54_p0 = scmp.ne.s32.totalorder %s15_s7, %s53_s8  ;;  %p59_p2 = scmp.lt.s32.totalorder %s53_s8, %s53_s8 }
   0x6   :  { %p60_p3 = por %p59_p2, %p58_p1 }
   0x8   :  { %p61_p4 = pnand %p60_p3, %p54_p0 }
   0xa   :  { %64 = shalt.err (!%p61_p4)
}
   0xb   :  { %17 = dma.hbm_to_vmem [thread:$0]  %s107_s0, 128, %s15_s7, [#allocation3]  }
   0xc   :  { %85 = dma.done.wait [#allocation3], 128  }
   0xd   :  { %86 = vsyncadd [#allocation3], 4294967168  ;;  %v21_v0 = vld [vmem:[#allocation2] sm:$0xff]  ;;  %s90_s11 = smov [#allocation5]  }
   0xe   :  { %v22_v1 = vmul.f32 0.5, %v21_v0  ;;  %s32_s12 = sshll.u32 %s90_s11, 4  ;;  %s33_s12 = int_to_ptr.vmem [resolvable:$true] %s32_s12 }
   0xf   :  { %s65_s13 = scalar_lea.vmem %s33_s12, 128  ;;  %p70_p6 = scmp.lt.s32.totalorder %s33_s12, %s33_s12 }
  0x10   :  { %43 = vtanh.f32 %v22_v1  ;;  %p66_p5 = scmp.ne.s32.totalorder %s33_s12, %s65_s13  ;;  %p71_p7 = scmp.lt.s32.totalorder %s65_s13, %s65_s13 }
  0x12   :  { %p72_p8 = por %p71_p7, %p70_p6 }
  0x14   :  { %p73_p9 = pnand %p72_p8, %p66_p5 }
  0x1d   :  { %v44_v2 = vpop.eup %43 }
  0x1e   :  { %v24_v3 = vadd.f32 1.0, %v44_v2 }
  0x20   :  { %25 = vst [vmem:[#allocation5] sm:$0xff] %v24_v3 }
  0x21   :  { %76 = shalt.err (!%p73_p9)
}
  0x22   :  { %35 = dma.vmem_to_hbm [thread:$0]  %s33_s12, 128, %s108_s1, [#allocation4]  }
  0x23   :  { %87 = dma.done.wait [#allocation4], 128  }
  0x24   :  { %88 = vsyncadd [#allocation4], 4294967168 }
  0x25   :  { %39 = vsyncpa [#allocation3], 1 }
  0x26   :  { %40 = vsyncpa [#allocation4], 1 }

</bundles_post_ra>
